<compile_context>
chip_gen: v7x
topology: tpu7x:2x2x1
jax: 0.10.0
libtpu: 0.0.40
codegen_flags: <defaults>
</compile_context>

<pallas_src>
import jax
import jax.numpy as jnp
from jax.experimental import pallas as pl
from jax.experimental.pallas import tpu as pltpu


# ----------------------------------------------------------------------------
# Fused matmul + bias kernel:  out = x @ W + b
# Used for (a) the hoisted input projection and (b) the linear head.
# ----------------------------------------------------------------------------
def _matmul_bias_kernel(x_ref, w_ref, b_ref, out_ref):
    out_ref[...] = (
        jnp.dot(x_ref[...], w_ref[...], preferred_element_type=jnp.float32)
        + b_ref[...]
    ).astype(out_ref.dtype)


def matmul_bias_pallas(x2d, w, b_row, *, tile_m=512):
    """x2d: (M, K); w: (K, N); b_row: (1, N) -> (M, N) float32."""
    M, K = x2d.shape
    N = w.shape[1]
    out_shape = jax.ShapeDtypeStruct((M, N), jnp.float32)

    # Row-tiled, megacore-parallel path for large M; single block otherwise.
    if M > tile_m and tile_m % 8 == 0 and M % tile_m == 0:
        return pl.pallas_call(
            _matmul_bias_kernel,
            out_shape=out_shape,
            grid=(M // tile_m,),
            in_specs=[
                pl.BlockSpec((tile_m, K), lambda i: (i, 0)),
                pl.BlockSpec((K, N), lambda i: (0, 0)),
                pl.BlockSpec((1, N), lambda i: (0, 0)),
            ],
            out_specs=pl.BlockSpec((tile_m, N), lambda i: (i, 0)),
            compiler_params=pltpu.CompilerParams(
                dimension_semantics=("parallel",)),
        )(x2d, w, b_row)

    return pl.pallas_call(_matmul_bias_kernel, out_shape=out_shape)(
        x2d, w, b_row)


# ----------------------------------------------------------------------------
# GRU recurrence kernel (single invocation, in-kernel time loop).
# Inputs:
#   xp_ref : (T, B, 3H)  precomputed  x @ [W_ir|W_iz|W_in] + [b_r|b_z|b_in]
#            where b_r = b_ir+b_hr, b_z = b_iz+b_hz (fully fused), and the
#            n-slot carries only b_in (b_hn must stay inside r*(...)).
#   wh_ref : (H, 3H)     fused [W_hr|W_hz|W_hn]
#   bhn_ref: (1, H)      b_hn
# PyTorch nn.GRU gate equations:
#   r = sigmoid(xW_ir + b_ir + hW_hr + b_hr)
#   z = sigmoid(xW_iz + b_iz + hW_hz + b_hz)
#   n = tanh  (xW_in + b_in + r * (hW_hn + b_hn))
#   h = (1 - z) * n + z * h
# ----------------------------------------------------------------------------
def _gru_recurrence_kernel(xp_ref, wh_ref, bhn_ref, out_ref, h_ref):
    T = xp_ref.shape[0]
    H = wh_ref.shape[0]

    h_ref[...] = jnp.zeros_like(h_ref)

    def step(t, carry):
        h = h_ref[...]                                   # (B, H)
        xp = xp_ref[t]                                   # (B, 3H)
        g = jnp.dot(h, wh_ref[...],
                    preferred_element_type=jnp.float32)  # (B, 3H), one MXU push
        r = jax.nn.sigmoid(xp[:, 0:H] + g[:, 0:H])
        z = jax.nn.sigmoid(xp[:, H:2 * H] + g[:, H:2 * H])
        n = jnp.tanh(xp[:, 2 * H:] + r * (g[:, 2 * H:] + bhn_ref[...]))
        h_new = (1.0 - z) * n + z * h
        h_ref[...] = h_new
        out_ref[t] = h_new.astype(out_ref.dtype)
        return carry

    jax.lax.fori_loop(0, T, step, 0)


def gru_recurrence_pallas(xp_tb3h, wh, bhn):
    """xp_tb3h: (T, B, 3H) time-major projected input -> (T, B, H)."""
    T, B, _ = xp_tb3h.shape
    H = wh.shape[0]
    return pl.pallas_call(
        _gru_recurrence_kernel,
        out_shape=jax.ShapeDtypeStruct((T, B, H), jnp.float32),
        scratch_shapes=[pltpu.VMEM((B, H), jnp.float32)],  # resident hidden state
    )(xp_tb3h, wh, bhn)


# ----------------------------------------------------------------------------
# Full model forward (mirrors GRUModel.forward)
# ----------------------------------------------------------------------------
def gru_model_forward(x_btf, gru_params, lin_wt, lin_b_row, horizon):
    """x_btf: (batch, window, features) -> (batch, horizon, output_dim)."""
    B, T, _ = x_btf.shape
    x = jnp.transpose(x_btf, (1, 0, 2))              # (T, B, D), time-major once
    for p in gru_params:
        D = x.shape[-1]
        H = p["wh"].shape[0]
        # Hoisted input projection over all timesteps at once (M = T*B rows).
        xp = matmul_bias_pallas(x.reshape(T * B, D), p["wi"], p["bi"])
        xp = xp.reshape(T, B, 3 * H)
        # Sequential recurrence: single kernel call, in-kernel time loop.
        x = gru_recurrence_pallas(xp, p["wh"], p["bhn"])          # (T, B, H)
    out_v = x[-horizon:]                             # (horizon, B, H) time-major
    Hz = out_v.shape[0]
    H = out_v.shape[2]
    y = matmul_bias_pallas(out_v.reshape(Hz * B, H), lin_wt, lin_b_row)
    y = y.reshape(Hz, B, -1)
    return jnp.transpose(y, (1, 0, 2))               # (B, horizon, output_dim)


# ----------------------------------------------------------------------------
# Deterministic parameter init (PyTorch-like uniform(-1/sqrt(H), 1/sqrt(H)))
# with fused weight / bias layouts.
# ----------------------------------------------------------------------------
def init_params(key, input_dim, hidden_dim, output_dim, num_layers):
    k = 1.0 / float(hidden_dim) ** 0.5
    H = hidden_dim

    def u(kk, shape):
        return jax.random.uniform(kk, shape, jnp.float32, -k, k)

    gru_params = []
    for layer in range(num_layers):
        d = input_dim if layer == 0 else hidden_dim
        key, k_wi, k_wh, k_bih, k_bhh = jax.random.split(key, 5)
        wi = u(k_wi, (d, 3 * H))            # [W_ir | W_iz | W_in]
        wh = u(k_wh, (H, 3 * H))            # [W_hr | W_hz | W_hn]
        b_ih = u(k_bih, (3 * H,))
        b_hh = u(k_bhh, (3 * H,))
        bi = jnp.concatenate([
            b_ih[0 * H:1 * H] + b_hh[0 * H:1 * H],   # r: b_ir + b_hr
            b_ih[1 * H:2 * H] + b_hh[1 * H:2 * H],   # z: b_iz + b_hz
            b_ih[2 * H:3 * H],                       # n: b_in only
        ]).reshape(1, 3 * H)
        bhn = b_hh[2 * H:3 * H].reshape(1, H)        # b_hn (stays inside r*(...))
        gru_params.append({"wi": wi, "wh": wh, "bi": bi, "bhn": bhn})

    key, k1, k2 = jax.random.split(key, 3)
    lin_wt = u(k1, (H, output_dim))                  # pre-transposed linear.weight.T
    lin_b = jax.random.uniform(k2, (output_dim,), jnp.float32, -k, k)
    return gru_params, lin_wt, lin_b.reshape(1, output_dim)


# ----------------------------------------------------------------------------
# Pure-JAX reference (lax.scan) for correctness check
# ----------------------------------------------------------------------------
def ref_forward(x_btf, gru_params, lin_wt, lin_b_row, horizon):
    x = jnp.transpose(x_btf, (1, 0, 2))              # (T, B, D)
    for p in gru_params:
        B = x.shape[1]
        H = p["wh"].shape[0]
        xp = jnp.einsum("tbd,dh->tbh", x, p["wi"]) + p["bi"]

        def step(h, xpt, p=p, H=H):
            g = h @ p["wh"]
            r = jax.nn.sigmoid(xpt[:, 0:H] + g[:, 0:H])
            z = jax.nn.sigmoid(xpt[:, H:2 * H] + g[:, H:2 * H])
            n = jnp.tanh(xpt[:, 2 * H:] + r * (g[:, 2 * H:] + p["bhn"]))
            hn = (1.0 - z) * n + z * h
            return hn, hn

        _, x = jax.lax.scan(step, jnp.zeros((B, H), jnp.float32), xp)
    out = x[-horizon:]                               # (horizon, B, H)
    y = out @ lin_wt + lin_b_row                     # (horizon, B, O)
    return jnp.transpose(y, (1, 0, 2))


if __name__ == "__main__":
    # Small shapes consistent with GRUModel.forward:  X: (batch, window, features)
    batch, window = 2, 8
    input_dim, hidden_dim, output_dim = 4, 32, 3
    num_layers, horizon = 2, 4

    key = jax.random.PRNGKey(0)
    key, kx = jax.random.split(key)
    x = jax.random.normal(kx, (batch, window, input_dim), jnp.float32)

    gru_params, lin_wt, lin_b = init_params(
        key, input_dim, hidden_dim, output_dim, num_layers)

    fwd = jax.jit(
        lambda xin: gru_model_forward(xin, gru_params, lin_wt, lin_b, horizon))
    out = jax.block_until_ready(fwd(x))

    ref = jax.block_until_ready(
        ref_forward(x, gru_params, lin_wt, lin_b, horizon))

    assert out.shape == (batch, horizon, output_dim), out.shape
    assert jnp.allclose(out, ref, rtol=1e-4, atol=1e-4), \
        float(jnp.max(jnp.abs(out - ref)))

    print("KERNEL_OK")
</pallas_src>

<mosaic_0001>
module attributes {stable_mosaic.version = 11 : i64} {
  func.func @_matmul_bias_kernel(%arg0: memref<16x4xf32, #tpu.memory_space<vmem>>, %arg1: memref<4x96xf32, #tpu.memory_space<vmem>>, %arg2: memref<1x96xf32, #tpu.memory_space<vmem>>, %arg3: memref<16x96xf32, #tpu.memory_space<vmem>>) attributes {dimension_semantics = [], scalar_prefetch = 0 : i64, scratch_operands = 0 : i64, tpu.core_type = #tpu.core_type<tc>} {
    %c0 = arith.constant 0 : index
    %c0_0 = arith.constant 0 : index
    %0 = vector.load %arg0[%c0, %c0_0] : memref<16x4xf32, #tpu.memory_space<vmem>>, vector<16x4xf32>
    %c0_1 = arith.constant 0 : index
    %c0_2 = arith.constant 0 : index
    %1 = vector.load %arg1[%c0_1, %c0_2] : memref<4x96xf32, #tpu.memory_space<vmem>>, vector<4x96xf32>
    %cst = arith.constant dense<0.000000e+00> : vector<16x96xf32>
    %2 = tpu.matmul %0, %1, %cst {dimension_numbers = #tpu.dot_dimension_numbers<[1], [0], [0], [1], [0, 0, 1, 1], [], []>} : vector<16x4xf32>, vector<4x96xf32>, vector<16x96xf32> -> vector<16x96xf32>
    %c0_3 = arith.constant 0 : index
    %c0_4 = arith.constant 0 : index
    %3 = vector.load %arg2[%c0_3, %c0_4] : memref<1x96xf32, #tpu.memory_space<vmem>>, vector<1x96xf32>
    %4 = vector.broadcast %3 : vector<1x96xf32> to vector<16x96xf32>
    %5 = arith.addf %2, %4 : vector<16x96xf32>
    %c0_5 = arith.constant 0 : index
    %c0_6 = arith.constant 0 : index
    %6 = vector.load %arg3[%c0_5, %c0_6] : memref<16x96xf32, #tpu.memory_space<vmem>>, vector<16x96xf32>
    tpu.vector_store %arg3[%c0_5, %c0_6], %5 {strides = array<i32>} : memref<16x96xf32, #tpu.memory_space<vmem>>, vector<16x96xf32>,
    return
  }
}

module attributes {stable_mosaic.version = 11 : i64} {
  func.func @_gru_recurrence_kernel(%arg0: memref<8x2x96xf32, #tpu.memory_space<vmem>>, %arg1: memref<32x96xf32, #tpu.memory_space<vmem>>, %arg2: memref<1x32xf32, #tpu.memory_space<vmem>>, %arg3: memref<8x2x32xf32, #tpu.memory_space<vmem>>, %arg4: memref<2x32xf32, #tpu.memory_space<vmem>>) attributes {dimension_semantics = [], scalar_prefetch = 0 : i64, scratch_operands = 1 : i64, tpu.core_type = #tpu.core_type<tc>} {
    %cst = arith.constant 0.000000e+00 : f32
    %0 = vector.broadcast %cst : f32 to vector<2x32xf32>
    %c0 = arith.constant 0 : index
    %c0_0 = arith.constant 0 : index
    %1 = vector.load %arg4[%c0, %c0_0] : memref<2x32xf32, #tpu.memory_space<vmem>>, vector<2x32xf32>
    tpu.vector_store %arg4[%c0, %c0_0], %0 {strides = array<i32>} : memref<2x32xf32, #tpu.memory_space<vmem>>, vector<2x32xf32>,
    %c0_i32 = arith.constant 0 : i32
    %c8_i32 = arith.constant 8 : i32
    %2 = arith.addi %c0_i32, %c8_i32 : i32
    %c1_i32 = arith.constant 1 : i32
    scf.for %arg5 = %c0_i32 to %2 step %c1_i32  : i32 {
      %c0_2 = arith.constant 0 : index
      %c0_3 = arith.constant 0 : index
      %3 = vector.load %arg4[%c0_2, %c0_3] : memref<2x32xf32, #tpu.memory_space<vmem>>, vector<2x32xf32>
      %4 = arith.index_cast %arg5 : i32 to index
      %c0_4 = arith.constant 0 : index
      %c0_5 = arith.constant 0 : index
      %5 = vector.load %arg0[%4, %c0_4, %c0_5] : memref<8x2x96xf32, #tpu.memory_space<vmem>>, vector<1x2x96xf32>
      %6 = vector.shape_cast %5 : vector<1x2x96xf32> to vector<2x96xf32>
      %c0_6 = arith.constant 0 : index
      %c0_7 = arith.constant 0 : index
      %7 = vector.load %arg1[%c0_6, %c0_7] : memref<32x96xf32, #tpu.memory_space<vmem>>, vector<32x96xf32>
      %cst_8 = arith.constant dense<0.000000e+00> : vector<2x96xf32>
      %8 = tpu.matmul %3, %7, %cst_8 {dimension_numbers = #tpu.dot_dimension_numbers<[1], [0], [0], [1], [0, 0, 1, 1], [], []>} : vector<2x32xf32>, vector<32x96xf32>, vector<2x96xf32> -> vector<2x96xf32>
      %9 = vector.extract_strided_slice %6 {offsets = [0, 0], sizes = [2, 32], strides = [1, 1]} : vector<2x96xf32> to vector<2x32xf32>
      %10 = vector.extract_strided_slice %8 {offsets = [0, 0], sizes = [2, 32], strides = [1, 1]} : vector<2x96xf32> to vector<2x32xf32>
      %11 = arith.addf %9, %10 : vector<2x32xf32>
      %12 = arith.negf %11 : vector<2x32xf32>
      %13 = math.exp %12 : vector<2x32xf32>
      %cst_9 = arith.constant 1.000000e+00 : f32
      %14 = vector.broadcast %cst_9 : f32 to vector<2x32xf32>
      %15 = arith.addf %14, %13 : vector<2x32xf32>
      %16 = arith.divf %14, %15 : vector<2x32xf32>
      %17 = vector.extract_strided_slice %6 {offsets = [0, 32], sizes = [2, 32], strides = [1, 1]} : vector<2x96xf32> to vector<2x32xf32>
      %18 = vector.extract_strided_slice %8 {offsets = [0, 32], sizes = [2, 32], strides = [1, 1]} : vector<2x96xf32> to vector<2x32xf32>
      %19 = arith.addf %17, %18 : vector<2x32xf32>
      %20 = arith.negf %19 : vector<2x32xf32>
      %21 = math.exp %20 : vector<2x32xf32>
      %cst_10 = arith.constant 1.000000e+00 : f32
      %22 = vector.broadcast %cst_10 : f32 to vector<2x32xf32>
      %23 = arith.addf %22, %21 : vector<2x32xf32>
      %24 = arith.divf %22, %23 : vector<2x32xf32>
      %25 = vector.extract_strided_slice %6 {offsets = [0, 64], sizes = [2, 32], strides = [1, 1]} : vector<2x96xf32> to vector<2x32xf32>
      %26 = vector.extract_strided_slice %8 {offsets = [0, 64], sizes = [2, 32], strides = [1, 1]} : vector<2x96xf32> to vector<2x32xf32>
      %c0_11 = arith.constant 0 : index
      %c0_12 = arith.constant 0 : index
      %27 = vector.load %arg2[%c0_11, %c0_12] : memref<1x32xf32, #tpu.memory_space<vmem>>, vector<1x32xf32>
      %28 = vector.broadcast %27 : vector<1x32xf32> to vector<2x32xf32>
      %29 = arith.addf %26, %28 : vector<2x32xf32>
      %30 = arith.mulf %16, %29 : vector<2x32xf32>
      %31 = arith.addf %25, %30 : vector<2x32xf32>
      %32 = math.tanh %31 : vector<2x32xf32>
      %cst_13 = arith.constant 1.000000e+00 : f32
      %33 = vector.broadcast %cst_13 : f32 to vector<2x32xf32>
      %34 = arith.subf %33, %24 : vector<2x32xf32>
      %35 = arith.mulf %34, %32 : vector<2x32xf32>
      %36 = arith.mulf %24, %3 : vector<2x32xf32>
      %37 = arith.addf %35, %36 : vector<2x32xf32>
      %c0_14 = arith.constant 0 : index
      %c0_15 = arith.constant 0 : index
      %38 = vector.load %arg4[%c0_14, %c0_15] : memref<2x32xf32, #tpu.memory_space<vmem>>, vector<2x32xf32>
      tpu.vector_store %arg4[%c0_14, %c0_15], %37 {strides = array<i32>} : memref<2x32xf32, #tpu.memory_space<vmem>>, vector<2x32xf32>,
      %39 = arith.index_cast %arg5 : i32 to index
      %c0_16 = arith.constant 0 : index
      %c0_17 = arith.constant 0 : index
      %40 = vector.load %arg3[%39, %c0_16, %c0_17] : memref<8x2x32xf32, #tpu.memory_space<vmem>>, vector<1x2x32xf32>
      %41 = vector.shape_cast %40 : vector<1x2x32xf32> to vector<2x32xf32>
      %42 = vector.shape_cast %37 : vector<2x32xf32> to vector<1x2x32xf32>
      tpu.vector_store %arg3[%39, %c0_16, %c0_17], %42 {strides = array<i32>} : memref<8x2x32xf32, #tpu.memory_space<vmem>>, vector<1x2x32xf32>,
    }
    %c8_i32_1 = arith.constant 8 : i32
    return
  }
}

module attributes {stable_mosaic.version = 11 : i64} {
  func.func @_matmul_bias_kernel(%arg0: memref<16x32xf32, #tpu.memory_space<vmem>>, %arg1: memref<32x96xf32, #tpu.memory_space<vmem>>, %arg2: memref<1x96xf32, #tpu.memory_space<vmem>>, %arg3: memref<16x96xf32, #tpu.memory_space<vmem>>) attributes {dimension_semantics = [], scalar_prefetch = 0 : i64, scratch_operands = 0 : i64, tpu.core_type = #tpu.core_type<tc>} {
    %c0 = arith.constant 0 : index
    %c0_0 = arith.constant 0 : index
    %0 = vector.load %arg0[%c0, %c0_0] : memref<16x32xf32, #tpu.memory_space<vmem>>, vector<16x32xf32>
    %c0_1 = arith.constant 0 : index
    %c0_2 = arith.constant 0 : index
    %1 = vector.load %arg1[%c0_1, %c0_2] : memref<32x96xf32, #tpu.memory_space<vmem>>, vector<32x96xf32>
    %cst = arith.constant dense<0.000000e+00> : vector<16x96xf32>
    %2 = tpu.matmul %0, %1, %cst {dimension_numbers = #tpu.dot_dimension_numbers<[1], [0], [0], [1], [0, 0, 1, 1], [], []>} : vector<16x32xf32>, vector<32x96xf32>, vector<16x96xf32> -> vector<16x96xf32>
    %c0_3 = arith.constant 0 : index
    %c0_4 = arith.constant 0 : index
    %3 = vector.load %arg2[%c0_3, %c0_4] : memref<1x96xf32, #tpu.memory_space<vmem>>, vector<1x96xf32>
    %4 = vector.broadcast %3 : vector<1x96xf32> to vector<16x96xf32>
    %5 = arith.addf %2, %4 : vector<16x96xf32>
    %c0_5 = arith.constant 0 : index
    %c0_6 = arith.constant 0 : index
    %6 = vector.load %arg3[%c0_5, %c0_6] : memref<16x96xf32, #tpu.memory_space<vmem>>, vector<16x96xf32>
    tpu.vector_store %arg3[%c0_5, %c0_6], %5 {strides = array<i32>} : memref<16x96xf32, #tpu.memory_space<vmem>>, vector<16x96xf32>,
    return
  }
}

module attributes {stable_mosaic.version = 11 : i64} {
  func.func @_matmul_bias_kernel(%arg0: memref<8x32xf32, #tpu.memory_space<vmem>>, %arg1: memref<32x3xf32, #tpu.memory_space<vmem>>, %arg2: memref<1x3xf32, #tpu.memory_space<vmem>>, %arg3: memref<8x3xf32, #tpu.memory_space<vmem>>) attributes {dimension_semantics = [], scalar_prefetch = 0 : i64, scratch_operands = 0 : i64, tpu.core_type = #tpu.core_type<tc>} {
    %c0 = arith.constant 0 : index
    %c0_0 = arith.constant 0 : index
    %0 = vector.load %arg0[%c0, %c0_0] : memref<8x32xf32, #tpu.memory_space<vmem>>, vector<8x32xf32>
    %c0_1 = arith.constant 0 : index
    %c0_2 = arith.constant 0 : index
    %1 = vector.load %arg1[%c0_1, %c0_2] : memref<32x3xf32, #tpu.memory_space<vmem>>, vector<32x3xf32>
    %cst = arith.constant dense<0.000000e+00> : vector<8x3xf32>
    %2 = tpu.matmul %0, %1, %cst {dimension_numbers = #tpu.dot_dimension_numbers<[1], [0], [0], [1], [0, 0, 1, 1], [], []>} : vector<8x32xf32>, vector<32x3xf32>, vector<8x3xf32> -> vector<8x3xf32>
    %c0_3 = arith.constant 0 : index
    %c0_4 = arith.constant 0 : index
    %3 = vector.load %arg2[%c0_3, %c0_4] : memref<1x3xf32, #tpu.memory_space<vmem>>, vector<1x3xf32>
    %4 = vector.broadcast %3 : vector<1x3xf32> to vector<8x3xf32>
    %5 = arith.addf %2, %4 : vector<8x3xf32>
    %c0_5 = arith.constant 0 : index
    %c0_6 = arith.constant 0 : index
    %6 = vector.load %arg3[%c0_5, %c0_6] : memref<8x3xf32, #tpu.memory_space<vmem>>, vector<8x3xf32>
    tpu.vector_store %arg3[%c0_5, %c0_6], %5 {strides = array<i32>} : memref<8x3xf32, #tpu.memory_space<vmem>>, vector<8x3xf32>,
    return
  }
}

</mosaic_0001>

<bundles_post_ra>
// kernel: _lambda_.7
= control target key start
LH: loop header
LB: loop body
LE: loop exit
PB: predicated region body
PF: predicated region fallthrough
CT: control target
= control target key end

     0   :  { %vm27_vm0 = vcmask 261120   ;;  %vm109_vm1 = vcmask 785408   ;;  %s191_s1 = inlined_call_operand.vmem [shape: f32[32,96], index: 1, kind: input, shape index: {}]   ;;  %s192_s0 = inlined_call_operand.vmem [shape: f32[16,32], index: 0, kind: input, shape index: {}]   ;;  %s193_s2 = inlined_call_operand.vmem [shape: f32[1,96], index: 2, kind: input, shape index: {}]   ;;  %s194_s3 = inlined_call_operand.vmem [shape: f32[16,96], index: 3, kind: output, shape index: {}]  }
   0x1   :  { %v16_v0 = vld [vmem:[%s191_s1] sm:$0xff]  ;;  %v17_v1 = vld [vmem:[%s191_s1 + $0x8] sm:$0xff]  ;;  %v18_v2 = vld [vmem:[%s191_s1 + $0x10] sm:$0xff] }
   0x2   :  { %v136_v3 = vpack.c.bf16 %v17_v1, %v16_v0  ;;  %v19_v4 = vld [vmem:[%s191_s1 + $0x18] sm:$0xff]  ;;  %v14_v5 = vld [vmem:[%s192_s0] sm:$0xff]  ;;  %v15_v7 = vld [vmem:[%s192_s0 + $0x8] sm:$0xff] }
   0x3   :  { %v140_v6 = vpack.c.bf16 %v19_v4, %v18_v2  ;;  %133 = vmatprep.mubr.msk.f32.mxu0 %vm27_vm0, %v14_v5  ;;  %v116_v8 = vld [vmem:[%s193_s2] ss:$0 sm:$0xff] }
   0x4   :  { %137 = vmatprep.subr.bf16.mxu0 %v136_v3 }
   0x5   :  { %139 = vmatpush3.bf16.msra.mxu0 %v136_v3 }
   0x6   :  { %141 = vmatprep.subr.bf16.mxu0 %v140_v6 }
   0x9   :  { %143 = vmatpush3.bf16.msra.mxu0 %v140_v6 }
   0xc   :  { %134 = vmatmul.mubr.msk.f32.vlgmr.msra.gmra.mrb[0].mxu0 %vm27_vm0, %v15_v7 }
  0xdf   :  { %v135_v9 = vpop.f32.mrb[0].mxu0 }
  0xe0   :  { %v106_v10 = vadd.f32 %v135_v9, %v116_v8  ;;  %v100_v11 = vpop.f32.mrb[1].mxu0 }
  0xe1   :  { %v101_v12 = vadd.f32 %v116_v8, %v100_v11 }
  0xe2   :  { %111 = vst.msk [vmem:[%s194_s3 + $0x8] sm:$0xff] %vm109_vm1, %v106_v10 }
  0xe3   :  { %110 = vst.msk [vmem:[%s194_s3] sm:$0xff] %vm109_vm1, %v101_v12 }

// kernel: _lambda_.5
= control target key start
LH: loop header
LB: loop body
LE: loop exit
PB: predicated region body
PF: predicated region fallthrough
CT: control target
= control target key end

     0   :  { %vm31_vm0 = vcmask 1043456   ;;  %vm24_vm1 = vcmask 31744   ;;  %vm110_vm2 = vcmask 785408   ;;  %s167_s1 = inlined_call_operand.vmem [shape: f32[4,96], index: 1, kind: input, shape index: {}]   ;;  %s168_s0 = inlined_call_operand.vmem [shape: f32[16,4], index: 0, kind: input, shape index: {}]   ;;  %s169_s2 = inlined_call_operand.vmem [shape: f32[1,96], index: 2, kind: input, shape index: {}]   ;;  %s170_s3 = inlined_call_operand.vmem [shape: f32[16,96], index: 3, kind: output, shape index: {}]  }
   0x1   :  { %v16_v0 = vld [vmem:[%s167_s1] sm:$0xf]  ;;  %v15_v2 = vld [vmem:[%s168_s0 + $0x8] sm:$0xff] }
   0x2   :  { %v14_v1 = vld [vmem:[%s168_s0] sm:$0xff]  ;;  %124 = vmatprep.subr.msk.mxu0 %vm31_vm0, %v16_v0 }
   0x3   :  { %126 = vmatprep.mubr.msk.f32.mxu0 %vm24_vm1, %v14_v1  ;;  %125 = vmatpush3.msk.msra.mxu0 %vm31_vm0, %v16_v0  ;;  %v117_v3 = vld [vmem:[%s169_s2] ss:$0 sm:$0xff] }
   0x4   :  { %127 = vmatmul.mubr.msk.f32.vlgmr.msra.gmra.mrb[0].mxu0 %vm24_vm1, %v15_v2 }
  0xd7   :  { %v128_v4 = vpop.f32.mrb[0].mxu0 }
  0xd8   :  { %v107_v5 = vadd.f32 %v128_v4, %v117_v3  ;;  %v101_v6 = vpop.f32.mrb[1].mxu0 }
  0xd9   :  { %v102_v7 = vadd.f32 %v117_v3, %v101_v6 }
  0xda   :  { %112 = vst.msk [vmem:[%s170_s3 + $0x8] sm:$0xff] %vm110_vm2, %v107_v5 }
  0xdb   :  { %111 = vst.msk [vmem:[%s170_s3] sm:$0xff] %vm110_vm2, %v102_v7 }

// kernel: _lambda_.6
= control target key start
LH: loop header
LB: loop body
LE: loop exit
PB: predicated region body
PF: predicated region fallthrough
CT: control target
= control target key end

     0   :  { %vm14_vm0 = vcmask 254976   ;;  %v218_v0 = vmov 0.0   ;;  %s246_s12 = smov 0   ;;  %s278_s0 = inlined_call_operand.vmem [shape: f32[8,2,96], index: 0, kind: input, shape index: {}]   ;;  %s279_s1 = inlined_call_operand.vmem [shape: f32[32,96], index: 1, kind: input, shape index: {}]   ;;  %s280_s2 = inlined_call_operand.vmem [shape: f32[1,32], index: 2, kind: input, shape index: {}]   ;;  %s281_s3 = inlined_call_operand.vmem [shape: f32[8,2,32], index: 3, kind: output, shape index: {}]  }
   0x1   :  { %15 = vst.msk [vmem:[#allocation2] sm:$0x3] %vm14_vm0, %v218_v0 }
   0x2 LB: > { %v26_v1 = vld [vmem:[%s279_s1] sm:$0xff]  ;;  %v27_v2 = vld [vmem:[%s279_s1 + $0x8] sm:$0xff]  ;;  %v28_v3 = vld [vmem:[%s279_s1 + $0x10] sm:$0xff]  ;;  %v219_v4 = vmov 0.0|0.0   ;;  %vm220_vm1 = vmmov 0   ;;  %v221_v7 = vmov 0.0   ;;  %s216_s12 = sphi %s246_s12, %s21_s12  }
   0x3   : > { %183 = vmatprep.subr.bf16.mxu0 %v219_v4  ;;  %v184_v5 = vpack.c.bf16 %v27_v2, %v26_v1  ;;  %v29_v6 = vld [vmem:[%s279_s1 + $0x18] sm:$0xff]  ;;  %180 = vmatprep.mubr.msk.f32.mxu0 %vm220_vm1, %v221_v7  ;;  %v166_v8 = vld [vmem:[%s280_s2] ss:$0 sm:$0xff]  ;;  %s222_s23 = smov 64   ;;  %vm30_vm2 = vcmask 261120   ;;  %s223_s24 = smov 32  }
   0x4   : > { %v187_v9 = vpack.c.bf16 %v29_v6, %v28_v3  ;;  %117 = vrot.lane.b32.xlu0 %v166_v8, %s222_s23  ;;  %s163_s25 = sshll.u32 %s216_s12, 1  ;;  %s224_s29 = smov 96  }
   0x5   : > { %185 = vmatpush3.bf16.msra.mxu0 %v184_v5  ;;  %s24_s28 = scalar_lea.vmem %s278_s0, %s163_s25  ;;  %s148_s5 = scalar_lea.vmem %s281_s3, %s163_s25 }
   0x6   : > { %186 = vmatprep.subr.bf16.mxu0 %v219_v4  ;;  %v25_v15 = vld [vmem:[%s24_s28] sm:$0x3]  ;;  %s21_s12 = sadd.s32 1, %s216_s12  }
   0x7   : > { %p18_p0 = scmp.ge.s32.totalorder %s21_s12, 8  }
   0x8   : > { %v22_v10 = vld [vmem:[#allocation2] sm:$0x3] }
   0x9   : > { %188 = vmatpush3.bf16.msra.mxu0 %v187_v9 }
   0xc   : > { %181 = vmatmul.mubr.msk.f32.vlgmr.msra.gmra.mrb[0].mxu0 %vm30_vm2, %v22_v10 }
  0x76   : > { %v118_v11 = vpop.permute.xlu0 %117 }
  0xdf   : > { %v100_v12 = vpop.f32.mrb[0].mxu0 }
  0xe0   : > { %v120_v13 = vadd.f32 %v118_v11, %v100_v12  ;;  %v182_v14 = vpop.f32.mrb[1].mxu0  ;;  %v104_v16 = vadd.f32 %v100_v12, %v25_v15 }
  0xe2   : > { %122 = vrot.lane.b32.xlu0 %v120_v13, %s222_s23  ;;  %v165_v17 = vmul.f32 -1.442695, %v104_v16 }
  0xe4   : > { %204 = vpow2.f32 %v165_v17 }
  0xe6   : > { %138 = vrot.lane.b32.xlu0 %v22_v10, %s223_s24 }
  0xee   : > { %v205_v18 = vpop.eup %204 }
  0xef   : > { %v108_v19 = vadd.f32 1.0, %v205_v18 }
  0xf1   : > { %206 = vrcp.f32 %v108_v19 }
  0xfb   : > { %v207_v20 = vpop.eup %206 }
  0xfc   : > { %v132_v27 = vsub.f32 1.0, %v207_v20 }
 0x154   : > { %v123_v21 = vpop.permute.xlu0 %122 }
 0x155   : > { %v125_v22 = vmul.f32 %v207_v20, %v123_v21 }
 0x157   : > { %127 = vrot.lane.b32.xlu1 %v125_v22, %s222_s23 }
 0x158   : > { %v139_v26 = vpop.permute.xlu0 %138 }
 0x159   : > { %v141_v29 = vmul.f32 %v207_v20, %v139_v26 }
 0x1c9   : > { %v128_v23 = vpop.permute.xlu1 %127 }
 0x1ca   : > { %v130_v24 = vadd.f32 %v128_v23, %v25_v15 }
 0x1cc   : > { %208 = vtanh.f32 %v130_v24 }
 0x1d6   : > { %v209_v25 = vpop.eup %208 }
 0x1d7   : > { %134 = vrot.lane.b32.xlu1 %v209_v25, %s224_s29 }
 0x249   : > { %v135_v28 = vpop.permute.xlu1 %134 }
 0x24a   : > { %v137_v30 = vmul.f32 %v135_v28, %v132_v27 }
 0x24c   : > { %v142_v31 = vadd.f32 %v141_v29, %v137_v30 }
 0x24e   : > { %144 = vrot.lane.b32.xlu1 %v142_v31, %s224_s29 }
 0x2bb   :  { %20 = sbr.rel (!%p18_p0) target bundleno = 2 (0x2), region = 41 }
 0x2c0   : > { %v145_v32 = vpop.permute.xlu1 %144 }
 0x2c1   : > { %147 = vst.msk [vmem:[#allocation2] sm:$0x3] %vm14_vm0, %v145_v32  ;;  %149 = vst.msk [vmem:[%s148_s5] sm:$0x3] %vm14_vm0, %v145_v32 }

// kernel: _lambda_.9
= control target key start
LH: loop header
LB: loop body
LE: loop exit
PB: predicated region body
PF: predicated region fallthrough
CT: control target
= control target key end

     0   :  { %v133_v0 = vmov 0.0|0.0   ;;  %vm134_vm0 = vmmov 0   ;;  %v135_v4 = vmov 0.0   ;;  %vm26_vm1 = vcmask 261120   ;;  %s177_s1 = inlined_call_operand.vmem [shape: f32[32,3], index: 1, kind: input, shape index: {}]   ;;  %s178_s0 = inlined_call_operand.vmem [shape: f32[8,32], index: 0, kind: input, shape index: {}]   ;;  %s179_s2 = inlined_call_operand.vmem [shape: f32[1,3], index: 2, kind: input, shape index: {}]   ;;  %s180_s3 = inlined_call_operand.vmem [shape: f32[8,3], index: 3, kind: output, shape index: {}]  }
   0x1   :  { %124 = vmatprep.subr.bf16.mxu0 %v133_v0  ;;  %v15_v1 = vld [vmem:[%s177_s1] sm:$0xff]  ;;  %v16_v2 = vld [vmem:[%s177_s1 + $0x8] sm:$0xff]  ;;  %v17_v3 = vld [vmem:[%s177_s1 + $0x10] sm:$0xff]  ;;  %121 = vmatprep.mubr.msk.f32.mxu0 %vm134_vm0, %v135_v4  ;;  %vm100_vm2 = vcmask 23552  }
   0x2   :  { %v125_v5 = vpack.c.bf16 %v16_v2, %v15_v1  ;;  %v18_v6 = vld [vmem:[%s177_s1 + $0x18] sm:$0xff]  ;;  %v14_v8 = vld [vmem:[%s178_s0] sm:$0xff] }
   0x3   :  { %v128_v7 = vpack.c.bf16 %v18_v6, %v17_v3  ;;  %v106_v9 = vld [vmem:[%s179_s2] ss:$0 sm:$0xff] }
   0x4   :  { %126 = vmatpush3.bf16.msra.mxu0 %v125_v5 }
   0x5   :  { %127 = vmatprep.subr.bf16.mxu0 %v133_v0 }
   0x8   :  { %129 = vmatpush3.bf16.msra.mxu0 %v128_v7 }
   0xb   :  { %122 = vmatmul.mubr.msk.f32.vlgmr.msra.gmra.mrb[0].mxu0 %vm26_vm1, %v14_v8 }
  0xde   :  { %v96_v10 = vpop.f32.mrb[0].mxu0 }
  0xdf   :  { %v97_v11 = vadd.f32 %v106_v9, %v96_v10  ;;  %v123_v12 = vpop.f32.mrb[1].mxu0 }
  0xe1   :  { %101 = vst.msk [vmem:[%s180_s3] sm:$0xff] %vm100_vm2, %v97_v11 }

</bundles_post_ra>
